<compile_context>
chip_gen: v7x
topology: tpu7x:2x2x1
jax: 0.10.0
libtpu: 0.0.40
codegen_flags: <defaults>
</compile_context>

<pallas_src>
import jax
import jax.numpy as jnp
from jax.experimental import pallas as pl
from jax.experimental.pallas import tpu as pltpu


# ----------------------------------------------------------------------------
# Fused kernel: embedding gather + 3x bidirectional GRU + Linear + LogSoftmax
# ----------------------------------------------------------------------------
def fused_rnn_kernel(tok_ref, emb_ref, hid_ref, *refs):
    (wih0, whh0, bih0, bhh0,
     wih1, whh1, bih1, bhh1,
     wih2, whh2, bih2, bhh2,
     out_w_ref, out_b_ref,
     logp_ref, hid_out_ref) = refs

    V, H = emb_ref.shape
    tok = tok_ref[0]

    # Embedding row gather (V is tiny): masked sum over rows avoids dynamic
    # sublane slicing and stays entirely on the VPU.
    row_ids = jax.lax.broadcasted_iota(jnp.int32, (V, 1), 0)
    x = jnp.sum(jnp.where(row_ids == tok, emb_ref[...], 0.0),
                axis=0, keepdims=True)                            # (1, H)

    layer_params = ((wih0, whh0, bih0, bhh0),
                    (wih1, whh1, bih1, bhh1),
                    (wih2, whh2, bih2, bhh2))

    # PyTorch GRU gate order (r, z, n); both directions computed jointly.
    for layer, (wih, whh, bih, bhh) in enumerate(layer_params):
        h = hid_ref[pl.ds(layer, 1), :]                           # (1, 2H) = [h_f | h_b]
        gi = jnp.dot(x, wih[...], preferred_element_type=jnp.float32) + bih[...]
        gh = jnp.dot(h, whh[...], preferred_element_type=jnp.float32) + bhh[...]
        r = jax.nn.sigmoid(gi[:, :2 * H] + gh[:, :2 * H])
        z = jax.nn.sigmoid(gi[:, 2 * H:4 * H] + gh[:, 2 * H:4 * H])
        n = jnp.tanh(gi[:, 4 * H:] + r * gh[:, 4 * H:])
        h_new = (1.0 - z) * n + z * h                             # (1, 2H)
        hid_out_ref[pl.ds(layer, 1), :] = h_new
        x = h_new                                                 # layer output = [h_f | h_b]

    # Linear + LogSoftmax (dim=-1, matches nn.LogSoftmax(dim=2) on (1,1,O)).
    logits = jnp.dot(x, out_w_ref[...],
                     preferred_element_type=jnp.float32) + out_b_ref[...]
    m = jnp.max(logits, axis=-1, keepdims=True)
    shifted = logits - m
    lse = jnp.log(jnp.sum(jnp.exp(shifted), axis=-1, keepdims=True))
    logp_ref[...] = shifted - lse


def rnn_forward(packed, token, hidden):
    """token: scalar int32; hidden: (6, 1, H).  Returns ((1,1,O), (6,1,H))."""
    emb = packed["embedding"]
    V, H = emb.shape
    O = packed["out_b"].shape[1]

    tok = jnp.asarray(token, jnp.int32).reshape(1)
    hid2 = hidden.astype(jnp.float32).reshape(3, 2 * H)           # row l = [h_f | h_b]

    gru_flat = []
    for layer in packed["gru"]:
        gru_flat.extend(layer)

    vmem = pl.BlockSpec(memory_space=pltpu.MemorySpace.VMEM)
    n_vmem_inputs = 2 + len(gru_flat) + 2                         # emb, hid, 12 gru, out_w, out_b

    grid_spec = pltpu.PrefetchScalarGridSpec(
        num_scalar_prefetch=1,           # token -> SMEM
        grid=(),                         # single invocation, everything resident
        in_specs=[vmem] * n_vmem_inputs,
        out_specs=(vmem, vmem),
    )

    logp, hid_new = pl.pallas_call(
        fused_rnn_kernel,
        grid_spec=grid_spec,
        out_shape=(jax.ShapeDtypeStruct((1, O), jnp.float32),
                   jax.ShapeDtypeStruct((3, 2 * H), jnp.float32)),
    )(tok, emb, hid2, *gru_flat, packed["out_w"], packed["out_b"])

    # TODO(synk): could alias the hidden input to output 1 via input_output_aliases
    # to save one (tiny, ~768 B) HBM copy; skipped to keep the contract simple.
    return logp.reshape(1, 1, O), hid_new.reshape(6, 1, H)


# ----------------------------------------------------------------------------
# Parameters: PyTorch-shaped (per-direction, gate order r,z,n, pre-transposed)
# plus a packer that builds the fused, direction-merged kernel layout.
# ----------------------------------------------------------------------------
def init_params(key, vocab_size, hidden_size, output_size):
    H = hidden_size
    scale = 1.0 / jnp.sqrt(jnp.float32(H))
    keys = iter(jax.random.split(key, 2 + 3 * 2 * 4 + 2))

    def unif(shape):
        return jax.random.uniform(next(keys), shape, jnp.float32, -scale, scale)

    params = {}
    # nn.Embedding.from_pretrained(weights): embedding_dim must equal H so that
    # view(1,1,-1) feeds GRU(hidden_size, ...).
    params["embedding"] = jax.random.normal(next(keys), (vocab_size, H), jnp.float32)

    gru = []
    for layer in range(3):
        d_in = H if layer == 0 else 2 * H
        dirs = []
        for _direction in range(2):
            wih_t = unif((d_in, 3 * H))   # transpose of PyTorch weight_ih (3H, d_in)
            whh_t = unif((H, 3 * H))      # transpose of PyTorch weight_hh (3H, H)
            bih = unif((1, 3 * H))
            bhh = unif((1, 3 * H))
            dirs.append((wih_t, whh_t, bih, bhh))
        gru.append(dirs)
    params["gru"] = gru

    params["out_w"] = unif((2 * H, output_size))  # transpose of nn.Linear weight
    params["out_b"] = unif((1, output_size))
    return params


def pack_params(params, H):
    """Merge fwd/bwd per layer: gate-major columns [r_f, r_b, z_f, z_b, n_f, n_b]."""
    def interleave_cols(a_f, a_b):
        cols = []
        for g in range(3):
            cols.append(a_f[:, g * H:(g + 1) * H])
            cols.append(a_b[:, g * H:(g + 1) * H])
        return jnp.concatenate(cols, axis=1)

    gru = []
    for layer in range(3):
        wih_f, whh_f, bih_f, bhh_f = params["gru"][layer][0]
        wih_b, whh_b, bih_b, bhh_b = params["gru"][layer][1]
        wih_cat = interleave_cols(wih_f, wih_b)                       # (D_in, 6H)
        bih_cat = interleave_cols(bih_f, bih_b)                       # (1, 6H)
        bhh_cat = interleave_cols(bhh_f, bhh_b)                       # (1, 6H)
        whh_bd = jnp.concatenate(                                     # (2H, 6H) block-diag
            [interleave_cols(whh_f, jnp.zeros_like(whh_f)),
             interleave_cols(jnp.zeros_like(whh_b), whh_b)], axis=0)
        gru.append((wih_cat, whh_bd, bih_cat, bhh_cat))

    return {"embedding": params["embedding"], "gru": tuple(gru),
            "out_w": params["out_w"], "out_b": params["out_b"]}


# ----------------------------------------------------------------------------
# Pure-JAX reference (unfused, per-direction) for numerical validation.
# ----------------------------------------------------------------------------
def _gru_cell_ref(x, h, wih_t, whh_t, bih, bhh, H):
    gi = x @ wih_t + bih
    gh = h @ whh_t + bhh
    i_r, i_z, i_n = gi[:, :H], gi[:, H:2 * H], gi[:, 2 * H:]
    h_r, h_z, h_n = gh[:, :H], gh[:, H:2 * H], gh[:, 2 * H:]
    r = jax.nn.sigmoid(i_r + h_r)
    z = jax.nn.sigmoid(i_z + h_z)
    n = jnp.tanh(i_n + r * h_n)
    return (1.0 - z) * n + z * h


def rnn_forward_ref(params, token, hidden, H):
    x = params["embedding"][token].reshape(1, -1)
    new_hidden = []
    for layer in range(3):
        hf = _gru_cell_ref(x, hidden[2 * layer], *params["gru"][layer][0], H)
        hb = _gru_cell_ref(x, hidden[2 * layer + 1], *params["gru"][layer][1], H)
        new_hidden += [hf, hb]
        x = jnp.concatenate([hf, hb], axis=1)
    logits = x @ params["out_w"] + params["out_b"]
    logp = jax.nn.log_softmax(logits, axis=-1)
    return logp.reshape(1, 1, -1), jnp.stack(new_hidden, axis=0)


if __name__ == "__main__":
    key = jax.random.PRNGKey(0)
    vocab_size, hidden_size, output_size = 10, 32, 16

    params = init_params(key, vocab_size, hidden_size, output_size)
    packed = pack_params(params, hidden_size)

    run = jax.jit(rnn_forward)

    # Step 1: initHidden() (zeros), token 3.
    token0 = jnp.array(3, dtype=jnp.int32)
    hidden0 = jnp.zeros((6, 1, hidden_size), jnp.float32)
    out1, hid1 = run(packed, token0, hidden0)
    # Step 2: feed the updated (non-zero) hidden back with a new token.
    token1 = jnp.array(7, dtype=jnp.int32)
    out2, hid2 = run(packed, token1, hid1)
    jax.block_until_ready((out1, hid1, out2, hid2))

    assert out1.shape == (1, 1, output_size)
    assert hid1.shape == (6, 1, hidden_size)
    assert abs(float(jnp.sum(jnp.exp(out1))) - 1.0) < 1e-4
    assert abs(float(jnp.sum(jnp.exp(out2))) - 1.0) < 1e-4

    # Validate fused kernel against the pure-JAX reference at both steps.
    out1_r, hid1_r = rnn_forward_ref(params, token0, hidden0, hidden_size)
    out2_r, hid2_r = rnn_forward_ref(params, token1, hid1_r, hidden_size)
    assert jnp.allclose(out1, out1_r, atol=5e-3, rtol=5e-3)
    assert jnp.allclose(hid1, hid1_r, atol=5e-3, rtol=5e-3)
    assert jnp.allclose(out2, out2_r, atol=5e-3, rtol=5e-3)
    assert jnp.allclose(hid2, hid2_r, atol=5e-3, rtol=5e-3)

    print("KERNEL_OK")
</pallas_src>

<mosaic_0001>
module attributes {stable_mosaic.version = 11 : i64} {
  func.func @fused_rnn_kernel(%arg0: memref<1xi32, #tpu.memory_space<smem>>, %arg1: memref<10x32xf32, #tpu.memory_space<vmem>>, %arg2: memref<3x64xf32, #tpu.memory_space<vmem>>, %arg3: memref<32x192xf32, #tpu.memory_space<vmem>>, %arg4: memref<64x192xf32, #tpu.memory_space<vmem>>, %arg5: memref<1x192xf32, #tpu.memory_space<vmem>>, %arg6: memref<1x192xf32, #tpu.memory_space<vmem>>, %arg7: memref<64x192xf32, #tpu.memory_space<vmem>>, %arg8: memref<64x192xf32, #tpu.memory_space<vmem>>, %arg9: memref<1x192xf32, #tpu.memory_space<vmem>>, %arg10: memref<1x192xf32, #tpu.memory_space<vmem>>, %arg11: memref<64x192xf32, #tpu.memory_space<vmem>>, %arg12: memref<64x192xf32, #tpu.memory_space<vmem>>, %arg13: memref<1x192xf32, #tpu.memory_space<vmem>>, %arg14: memref<1x192xf32, #tpu.memory_space<vmem>>, %arg15: memref<64x16xf32, #tpu.memory_space<vmem>>, %arg16: memref<1x16xf32, #tpu.memory_space<vmem>>, %arg17: memref<1x16xf32, #tpu.memory_space<vmem>>, %arg18: memref<3x64xf32, #tpu.memory_space<vmem>>) attributes {dimension_semantics = [], scalar_prefetch = 1 : i64, scratch_operands = 0 : i64, tpu.core_type = #tpu.core_type<tc>} {
    %c0 = arith.constant 0 : index
    %0 = memref.load %arg0[%c0] : memref<1xi32, #tpu.memory_space<smem>>
    %1 = tpu.iota {dimensions = array<i32: 0>} : vector<10x1xi32>
    %2 = vector.broadcast %0 : i32 to vector<10x1xi32>
    %3 = arith.cmpi eq, %1, %2 : vector<10x1xi32>
    %c0_0 = arith.constant 0 : index
    %c0_1 = arith.constant 0 : index
    %4 = vector.load %arg1[%c0_0, %c0_1] : memref<10x32xf32, #tpu.memory_space<vmem>>, vector<10x32xf32>
    %cst = arith.constant 0.000000e+00 : f32
    %5 = vector.shape_cast %3 : vector<10x1xi1> to vector<10x1xi1>
    %6 = vector.broadcast %5 : vector<10x1xi1> to vector<10x32xi1>
    %7 = vector.broadcast %cst : f32 to vector<10x32xf32>
    %8 = arith.select %6, %4, %7 : vector<10x32xi1>, vector<10x32xf32>
    %cst_2 = arith.constant dense<0.000000e+00> : vector<32xf32>
    %9 = vector.multi_reduction <add>, %8, %cst_2 [0] : vector<10x32xf32> to vector<32xf32>
    %10 = vector.shape_cast %9 : vector<32xf32> to vector<1x32xf32>
    %c0_3 = arith.constant 0 : index
    %c0_4 = arith.constant 0 : index
    %11 = vector.load %arg2[%c0_3, %c0_4] : memref<3x64xf32, #tpu.memory_space<vmem>>, vector<1x64xf32>
    %c0_5 = arith.constant 0 : index
    %c0_6 = arith.constant 0 : index
    %12 = vector.load %arg3[%c0_5, %c0_6] : memref<32x192xf32, #tpu.memory_space<vmem>>, vector<32x192xf32>
    %cst_7 = arith.constant dense<0.000000e+00> : vector<1x192xf32>
    %13 = tpu.matmul %10, %12, %cst_7 {dimension_numbers = #tpu.dot_dimension_numbers<[1], [0], [0], [1], [0, 0, 1, 1], [], []>} : vector<1x32xf32>, vector<32x192xf32>, vector<1x192xf32> -> vector<1x192xf32>
    %c0_8 = arith.constant 0 : index
    %c0_9 = arith.constant 0 : index
    %14 = vector.load %arg5[%c0_8, %c0_9] : memref<1x192xf32, #tpu.memory_space<vmem>>, vector<1x192xf32>
    %15 = arith.addf %13, %14 : vector<1x192xf32>
    %c0_10 = arith.constant 0 : index
    %c0_11 = arith.constant 0 : index
    %16 = vector.load %arg4[%c0_10, %c0_11] : memref<64x192xf32, #tpu.memory_space<vmem>>, vector<64x192xf32>
    %cst_12 = arith.constant dense<0.000000e+00> : vector<1x192xf32>
    %17 = tpu.matmul %11, %16, %cst_12 {dimension_numbers = #tpu.dot_dimension_numbers<[1], [0], [0], [1], [0, 0, 1, 1], [], []>} : vector<1x64xf32>, vector<64x192xf32>, vector<1x192xf32> -> vector<1x192xf32>
    %c0_13 = arith.constant 0 : index
    %c0_14 = arith.constant 0 : index
    %18 = vector.load %arg6[%c0_13, %c0_14] : memref<1x192xf32, #tpu.memory_space<vmem>>, vector<1x192xf32>
    %19 = arith.addf %17, %18 : vector<1x192xf32>
    %20 = vector.extract_strided_slice %15 {offsets = [0, 0], sizes = [1, 64], strides = [1, 1]} : vector<1x192xf32> to vector<1x64xf32>
    %21 = vector.extract_strided_slice %19 {offsets = [0, 0], sizes = [1, 64], strides = [1, 1]} : vector<1x192xf32> to vector<1x64xf32>
    %22 = arith.addf %20, %21 : vector<1x64xf32>
    %23 = arith.negf %22 : vector<1x64xf32>
    %24 = math.exp %23 : vector<1x64xf32>
    %cst_15 = arith.constant 1.000000e+00 : f32
    %25 = vector.broadcast %cst_15 : f32 to vector<1x64xf32>
    %26 = arith.addf %25, %24 : vector<1x64xf32>
    %27 = arith.divf %25, %26 : vector<1x64xf32>
    %28 = vector.extract_strided_slice %15 {offsets = [0, 64], sizes = [1, 64], strides = [1, 1]} : vector<1x192xf32> to vector<1x64xf32>
    %29 = vector.extract_strided_slice %19 {offsets = [0, 64], sizes = [1, 64], strides = [1, 1]} : vector<1x192xf32> to vector<1x64xf32>
    %30 = arith.addf %28, %29 : vector<1x64xf32>
    %31 = arith.negf %30 : vector<1x64xf32>
    %32 = math.exp %31 : vector<1x64xf32>
    %cst_16 = arith.constant 1.000000e+00 : f32
    %33 = vector.broadcast %cst_16 : f32 to vector<1x64xf32>
    %34 = arith.addf %33, %32 : vector<1x64xf32>
    %35 = arith.divf %33, %34 : vector<1x64xf32>
    %36 = vector.extract_strided_slice %15 {offsets = [0, 128], sizes = [1, 64], strides = [1, 1]} : vector<1x192xf32> to vector<1x64xf32>
    %37 = vector.extract_strided_slice %19 {offsets = [0, 128], sizes = [1, 64], strides = [1, 1]} : vector<1x192xf32> to vector<1x64xf32>
    %38 = arith.mulf %27, %37 : vector<1x64xf32>
    %39 = arith.addf %36, %38 : vector<1x64xf32>
    %40 = math.tanh %39 : vector<1x64xf32>
    %cst_17 = arith.constant 1.000000e+00 : f32
    %41 = vector.broadcast %cst_17 : f32 to vector<1x64xf32>
    %42 = arith.subf %41, %35 : vector<1x64xf32>
    %43 = arith.mulf %42, %40 : vector<1x64xf32>
    %44 = arith.mulf %35, %11 : vector<1x64xf32>
    %45 = arith.addf %43, %44 : vector<1x64xf32>
    %c0_18 = arith.constant 0 : index
    %c0_19 = arith.constant 0 : index
    %46 = vector.load %arg18[%c0_18, %c0_19] : memref<3x64xf32, #tpu.memory_space<vmem>>, vector<1x64xf32>
    tpu.vector_store %arg18[%c0_18, %c0_19], %45 {strides = array<i32>} : memref<3x64xf32, #tpu.memory_space<vmem>>, vector<1x64xf32>,
    %c1 = arith.constant 1 : index
    %c0_20 = arith.constant 0 : index
    %47 = vector.load %arg2[%c1, %c0_20] : memref<3x64xf32, #tpu.memory_space<vmem>>, vector<1x64xf32>
    %c0_21 = arith.constant 0 : index
    %c0_22 = arith.constant 0 : index
    %48 = vector.load %arg7[%c0_21, %c0_22] : memref<64x192xf32, #tpu.memory_space<vmem>>, vector<64x192xf32>
    %cst_23 = arith.constant dense<0.000000e+00> : vector<1x192xf32>
    %49 = tpu.matmul %45, %48, %cst_23 {dimension_numbers = #tpu.dot_dimension_numbers<[1], [0], [0], [1], [0, 0, 1, 1], [], []>} : vector<1x64xf32>, vector<64x192xf32>, vector<1x192xf32> -> vector<1x192xf32>
    %c0_24 = arith.constant 0 : index
    %c0_25 = arith.constant 0 : index
    %50 = vector.load %arg9[%c0_24, %c0_25] : memref<1x192xf32, #tpu.memory_space<vmem>>, vector<1x192xf32>
    %51 = arith.addf %49, %50 : vector<1x192xf32>
    %c0_26 = arith.constant 0 : index
    %c0_27 = arith.constant 0 : index
    %52 = vector.load %arg8[%c0_26, %c0_27] : memref<64x192xf32, #tpu.memory_space<vmem>>, vector<64x192xf32>
    %cst_28 = arith.constant dense<0.000000e+00> : vector<1x192xf32>
    %53 = tpu.matmul %47, %52, %cst_28 {dimension_numbers = #tpu.dot_dimension_numbers<[1], [0], [0], [1], [0, 0, 1, 1], [], []>} : vector<1x64xf32>, vector<64x192xf32>, vector<1x192xf32> -> vector<1x192xf32>
    %c0_29 = arith.constant 0 : index
    %c0_30 = arith.constant 0 : index
    %54 = vector.load %arg10[%c0_29, %c0_30] : memref<1x192xf32, #tpu.memory_space<vmem>>, vector<1x192xf32>
    %55 = arith.addf %53, %54 : vector<1x192xf32>
    %56 = vector.extract_strided_slice %51 {offsets = [0, 0], sizes = [1, 64], strides = [1, 1]} : vector<1x192xf32> to vector<1x64xf32>
    %57 = vector.extract_strided_slice %55 {offsets = [0, 0], sizes = [1, 64], strides = [1, 1]} : vector<1x192xf32> to vector<1x64xf32>
    %58 = arith.addf %56, %57 : vector<1x64xf32>
    %59 = arith.negf %58 : vector<1x64xf32>
    %60 = math.exp %59 : vector<1x64xf32>
    %cst_31 = arith.constant 1.000000e+00 : f32
    %61 = vector.broadcast %cst_31 : f32 to vector<1x64xf32>
    %62 = arith.addf %61, %60 : vector<1x64xf32>
    %63 = arith.divf %61, %62 : vector<1x64xf32>
    %64 = vector.extract_strided_slice %51 {offsets = [0, 64], sizes = [1, 64], strides = [1, 1]} : vector<1x192xf32> to vector<1x64xf32>
    %65 = vector.extract_strided_slice %55 {offsets = [0, 64], sizes = [1, 64], strides = [1, 1]} : vector<1x192xf32> to vector<1x64xf32>
    %66 = arith.addf %64, %65 : vector<1x64xf32>
    %67 = arith.negf %66 : vector<1x64xf32>
    %68 = math.exp %67 : vector<1x64xf32>
    %cst_32 = arith.constant 1.000000e+00 : f32
    %69 = vector.broadcast %cst_32 : f32 to vector<1x64xf32>
    %70 = arith.addf %69, %68 : vector<1x64xf32>
    %71 = arith.divf %69, %70 : vector<1x64xf32>
    %72 = vector.extract_strided_slice %51 {offsets = [0, 128], sizes = [1, 64], strides = [1, 1]} : vector<1x192xf32> to vector<1x64xf32>
    %73 = vector.extract_strided_slice %55 {offsets = [0, 128], sizes = [1, 64], strides = [1, 1]} : vector<1x192xf32> to vector<1x64xf32>
    %74 = arith.mulf %63, %73 : vector<1x64xf32>
    %75 = arith.addf %72, %74 : vector<1x64xf32>
    %76 = math.tanh %75 : vector<1x64xf32>
    %cst_33 = arith.constant 1.000000e+00 : f32
    %77 = vector.broadcast %cst_33 : f32 to vector<1x64xf32>
    %78 = arith.subf %77, %71 : vector<1x64xf32>
    %79 = arith.mulf %78, %76 : vector<1x64xf32>
    %80 = arith.mulf %71, %47 : vector<1x64xf32>
    %81 = arith.addf %79, %80 : vector<1x64xf32>
    %c1_34 = arith.constant 1 : index
    %c0_35 = arith.constant 0 : index
    %82 = vector.load %arg18[%c1_34, %c0_35] : memref<3x64xf32, #tpu.memory_space<vmem>>, vector<1x64xf32>
    tpu.vector_store %arg18[%c1_34, %c0_35], %81 {strides = array<i32>} : memref<3x64xf32, #tpu.memory_space<vmem>>, vector<1x64xf32>,
    %c2 = arith.constant 2 : index
    %c0_36 = arith.constant 0 : index
    %83 = vector.load %arg2[%c2, %c0_36] : memref<3x64xf32, #tpu.memory_space<vmem>>, vector<1x64xf32>
    %c0_37 = arith.constant 0 : index
    %c0_38 = arith.constant 0 : index
    %84 = vector.load %arg11[%c0_37, %c0_38] : memref<64x192xf32, #tpu.memory_space<vmem>>, vector<64x192xf32>
    %cst_39 = arith.constant dense<0.000000e+00> : vector<1x192xf32>
    %85 = tpu.matmul %81, %84, %cst_39 {dimension_numbers = #tpu.dot_dimension_numbers<[1], [0], [0], [1], [0, 0, 1, 1], [], []>} : vector<1x64xf32>, vector<64x192xf32>, vector<1x192xf32> -> vector<1x192xf32>
    %c0_40 = arith.constant 0 : index
    %c0_41 = arith.constant 0 : index
    %86 = vector.load %arg13[%c0_40, %c0_41] : memref<1x192xf32, #tpu.memory_space<vmem>>, vector<1x192xf32>
    %87 = arith.addf %85, %86 : vector<1x192xf32>
    %c0_42 = arith.constant 0 : index
    %c0_43 = arith.constant 0 : index
    %88 = vector.load %arg12[%c0_42, %c0_43] : memref<64x192xf32, #tpu.memory_space<vmem>>, vector<64x192xf32>
    %cst_44 = arith.constant dense<0.000000e+00> : vector<1x192xf32>
    %89 = tpu.matmul %83, %88, %cst_44 {dimension_numbers = #tpu.dot_dimension_numbers<[1], [0], [0], [1], [0, 0, 1, 1], [], []>} : vector<1x64xf32>, vector<64x192xf32>, vector<1x192xf32> -> vector<1x192xf32>
    %c0_45 = arith.constant 0 : index
    %c0_46 = arith.constant 0 : index
    %90 = vector.load %arg14[%c0_45, %c0_46] : memref<1x192xf32, #tpu.memory_space<vmem>>, vector<1x192xf32>
    %91 = arith.addf %89, %90 : vector<1x192xf32>
    %92 = vector.extract_strided_slice %87 {offsets = [0, 0], sizes = [1, 64], strides = [1, 1]} : vector<1x192xf32> to vector<1x64xf32>
    %93 = vector.extract_strided_slice %91 {offsets = [0, 0], sizes = [1, 64], strides = [1, 1]} : vector<1x192xf32> to vector<1x64xf32>
    %94 = arith.addf %92, %93 : vector<1x64xf32>
    %95 = arith.negf %94 : vector<1x64xf32>
    %96 = math.exp %95 : vector<1x64xf32>
    %cst_47 = arith.constant 1.000000e+00 : f32
    %97 = vector.broadcast %cst_47 : f32 to vector<1x64xf32>
    %98 = arith.addf %97, %96 : vector<1x64xf32>
    %99 = arith.divf %97, %98 : vector<1x64xf32>
    %100 = vector.extract_strided_slice %87 {offsets = [0, 64], sizes = [1, 64], strides = [1, 1]} : vector<1x192xf32> to vector<1x64xf32>
    %101 = vector.extract_strided_slice %91 {offsets = [0, 64], sizes = [1, 64], strides = [1, 1]} : vector<1x192xf32> to vector<1x64xf32>
    %102 = arith.addf %100, %101 : vector<1x64xf32>
    %103 = arith.negf %102 : vector<1x64xf32>
    %104 = math.exp %103 : vector<1x64xf32>
    %cst_48 = arith.constant 1.000000e+00 : f32
    %105 = vector.broadcast %cst_48 : f32 to vector<1x64xf32>
    %106 = arith.addf %105, %104 : vector<1x64xf32>
    %107 = arith.divf %105, %106 : vector<1x64xf32>
    %108 = vector.extract_strided_slice %87 {offsets = [0, 128], sizes = [1, 64], strides = [1, 1]} : vector<1x192xf32> to vector<1x64xf32>
    %109 = vector.extract_strided_slice %91 {offsets = [0, 128], sizes = [1, 64], strides = [1, 1]} : vector<1x192xf32> to vector<1x64xf32>
    %110 = arith.mulf %99, %109 : vector<1x64xf32>
    %111 = arith.addf %108, %110 : vector<1x64xf32>
    %112 = math.tanh %111 : vector<1x64xf32>
    %cst_49 = arith.constant 1.000000e+00 : f32
    %113 = vector.broadcast %cst_49 : f32 to vector<1x64xf32>
    %114 = arith.subf %113, %107 : vector<1x64xf32>
    %115 = arith.mulf %114, %112 : vector<1x64xf32>
    %116 = arith.mulf %107, %83 : vector<1x64xf32>
    %117 = arith.addf %115, %116 : vector<1x64xf32>
    %c2_50 = arith.constant 2 : index
    %c0_51 = arith.constant 0 : index
    %118 = vector.load %arg18[%c2_50, %c0_51] : memref<3x64xf32, #tpu.memory_space<vmem>>, vector<1x64xf32>
    tpu.vector_store %arg18[%c2_50, %c0_51], %117 {strides = array<i32>} : memref<3x64xf32, #tpu.memory_space<vmem>>, vector<1x64xf32>,
    %c0_52 = arith.constant 0 : index
    %c0_53 = arith.constant 0 : index
    %119 = vector.load %arg15[%c0_52, %c0_53] : memref<64x16xf32, #tpu.memory_space<vmem>>, vector<64x16xf32>
    %cst_54 = arith.constant dense<0.000000e+00> : vector<1x16xf32>
    %120 = tpu.matmul %117, %119, %cst_54 {dimension_numbers = #tpu.dot_dimension_numbers<[1], [0], [0], [1], [0, 0, 1, 1], [], []>} : vector<1x64xf32>, vector<64x16xf32>, vector<1x16xf32> -> vector<1x16xf32>
    %c0_55 = arith.constant 0 : index
    %c0_56 = arith.constant 0 : index
    %121 = vector.load %arg16[%c0_55, %c0_56] : memref<1x16xf32, #tpu.memory_space<vmem>>, vector<1x16xf32>
    %122 = arith.addf %120, %121 : vector<1x16xf32>
    %cst_57 = arith.constant dense<0xFF800000> : vector<1xf32>
    %123 = vector.multi_reduction <maximumf>, %122, %cst_57 [1] : vector<1x16xf32> to vector<1xf32>
    %124 = vector.shape_cast %123 : vector<1xf32> to vector<1x1xf32>
    %125 = vector.broadcast %124 : vector<1x1xf32> to vector<1x16xf32>
    %126 = arith.subf %122, %125 : vector<1x16xf32>
    %127 = math.exp %126 : vector<1x16xf32>
    %cst_58 = arith.constant dense<0.000000e+00> : vector<1xf32>
    %128 = vector.multi_reduction <add>, %127, %cst_58 [1] : vector<1x16xf32> to vector<1xf32>
    %129 = vector.shape_cast %128 : vector<1xf32> to vector<1x1xf32>
    %130 = math.log %129 : vector<1x1xf32>
    %131 = vector.broadcast %130 : vector<1x1xf32> to vector<1x16xf32>
    %132 = arith.subf %126, %131 : vector<1x16xf32>
    %c0_59 = arith.constant 0 : index
    %c0_60 = arith.constant 0 : index
    %133 = vector.load %arg17[%c0_59, %c0_60] : memref<1x16xf32, #tpu.memory_space<vmem>>, vector<1x16xf32>
    tpu.vector_store %arg17[%c0_59, %c0_60], %132 {strides = array<i32>} : memref<1x16xf32, #tpu.memory_space<vmem>>, vector<1x16xf32>,
    return
  }
}

</mosaic_0001>

<bundles_post_ra>
// kernel: rnn_forward.1
= control target key start
LH: loop header
LB: loop body
LE: loop exit
PB: predicated region body
PF: predicated region fallthrough
CT: control target
= control target key end

     0   :  { %s1892_s0 = inlined_call_operand.<no memory space> [shape: s32[1], index: 0, kind: input, shape index: {}]   ;;  %s1893_s1 = inlined_call_operand.hbm [shape: f32[10,32], index: 1, kind: input, shape index: {}]   ;;  %s1894_s2 = inlined_call_operand.vmem [shape: f32[3,64], index: 2, kind: input, shape index: {}]   ;;  %s1895_s3 = inlined_call_operand.hbm [shape: f32[32,192], index: 3, kind: input, shape index: {}]   ;;  %s1896_s4 = inlined_call_operand.hbm [shape: f32[64,192], index: 4, kind: input, shape index: {}]   ;;  %s1897_s5 = inlined_call_operand.hbm [shape: f32[1,192], index: 5, kind: input, shape index: {}]   ;;  %s1898_s6 = inlined_call_operand.hbm [shape: f32[1,192], index: 6, kind: input, shape index: {}]   ;;  %s1899_s7 = inlined_call_operand.vmem [shape: f32[64,192], index: 7, kind: input, shape index: {}]   ;;  %s1900_s8 = inlined_call_operand.hbm [shape: f32[64,192], index: 8, kind: input, shape index: {}]   ;;  %s1901_s9 = inlined_call_operand.hbm [shape: f32[1,192], index: 9, kind: input, shape index: {}]   ;;  %s1902_s10 = inlined_call_operand.hbm [shape: f32[1,192], index: 10, kind: input, shape index: {}]   ;;  %s1903_s11 = inlined_call_operand.hbm [shape: f32[64,192], index: 11, kind: input, shape index: {}]   ;;  %s1904_s12 = inlined_call_operand.hbm [shape: f32[64,192], index: 12, kind: input, shape index: {}]   ;;  %s1905_s13 = inlined_call_operand.vmem [shape: f32[1,192], index: 13, kind: input, shape index: {}]   ;;  %s1906_s14 = inlined_call_operand.vmem [shape: f32[1,192], index: 14, kind: input, shape index: {}]   ;;  %s1907_s15 = inlined_call_operand.vmem [shape: f32[64,16], index: 15, kind: input, shape index: {}]   ;;  %s1908_s16 = inlined_call_operand.vmem [shape: f32[1,16], index: 16, kind: input, shape index: {}]   ;;  %s1909_s17 = inlined_call_operand.hbm [shape: f32[1,16], index: 17, kind: output, shape index: {0}]   ;;  %s1910_s18 = inlined_call_operand.vmem [shape: f32[3,64], index: 18, kind: output, shape index: {1}]  }
   0x1   :  { %1914 = sst [smem:[#allocation29_spill]] %s1892_s0 }
   0x2   :  { %1915 = sst [smem:[#allocation30_spill]] %s1893_s1 }
   0x3   :  { %1916 = sst [smem:[#allocation31_spill]] %s1894_s2 }
   0x4   :  { %1917 = sst [smem:[#allocation32_spill]] %s1909_s17 }
   0x5   :  { %25 = vsyncpa [#allocation5], 0 }
   0x6   :  { %26 = vsyncpa [#allocation8], 0 }
   0x7   :  { %27 = vsyncpa [#allocation11], 0 }
   0x8   :  { %28 = vsyncpa [#allocation14], 0 }
   0x9   :  { %29 = vsyncpa [#allocation17], 0 }
   0xa   :  { %30 = vsyncpa [#allocation20], 0 }
   0xb   :  { %31 = vsyncpa [#allocation6], 0  ;;  %s1451_s27 = smov [#allocation7]   ;;  %s1195_s0 = scalar_lea.hbm %s1895_s3, 1024 }
   0xc   :  { %s51_s28 = sshll.u32 %s1451_s27, 4  ;;  %p1196_p0 = scmp.ne.s32.totalorder %s1895_s3, %s1195_s0  ;;  %s52_s28 = int_to_ptr.vmem [resolvable:$true] %s51_s28 }
   0xd   :  { %p1199_p1 = scmp.lt.u32.totalorder %s1195_s0, %s1895_s3 }
   0xf   :  { %p1201_p2 = pnand %p1199_p1, %p1196_p0 }
  0x11   :  { %1204 = shalt.err (!%p1201_p2)
}
  0x12   :  { %s1205_s22 = scalar_lea.vmem %s52_s28, 1024  ;;  %p1210_p4 = scmp.lt.s32.totalorder %s52_s28, %s52_s28 }
  0x13   :  { %p1206_p3 = scmp.ne.s32.totalorder %s52_s28, %s1205_s22  ;;  %p1211_p5 = scmp.lt.s32.totalorder %s1205_s22, %s1205_s22 }
  0x15   :  { %p1212_p6 = por %p1211_p5, %p1210_p4 }
  0x17   :  { %p1213_p7 = pnand %p1212_p6, %p1206_p3 }
  0x19   :  { %1216 = shalt.err (!%p1213_p7)
}
  0x1a   :  { %s1452_s2 = smov 256   ;;  %s1453_s23 = smov 16  }
  0x1b   :  { %57 = dma.hbm_to_vmem [thread:$0]  %s1895_s3, 1024, %s52_s28, [#allocation8], %s1452_s2, %s1452_s2, %s1453_s23  }
  0x1c   :  { %s1454_s26 = smov [#allocation10]   ;;  %s1455_s29 = smov [#allocation13]  }
  0x1d   :  { %s76_s27 = sshll.u32 %s1454_s26, 4  ;;  %s97_s30 = sshll.u32 %s1455_s29, 4  ;;  %s77_s27 = int_to_ptr.vmem [resolvable:$true] %s76_s27  ;;  %s98_s30 = int_to_ptr.vmem [resolvable:$true] %s97_s30 }
  0x1e   :  { %s1217_s1 = scalar_lea.hbm %s1897_s5, 32 }
  0x1f   :  { %p1218_p8 = scmp.ne.s32.totalorder %s1897_s5, %s1217_s1  ;;  %p1221_p9 = scmp.lt.u32.totalorder %s1217_s1, %s1897_s5 }
  0x21   :  { %p1223_p10 = pnand %p1221_p9, %p1218_p8 }
  0x23   :  { %1226 = shalt.err (!%p1223_p10)
}
  0x24   :  { %s1227_s3 = scalar_lea.vmem %s77_s27, 32  ;;  %p1232_p12 = scmp.lt.s32.totalorder %s77_s27, %s77_s27 }
  0x25   :  { %p1228_p11 = scmp.ne.s32.totalorder %s77_s27, %s1227_s3  ;;  %p1233_p13 = scmp.lt.s32.totalorder %s1227_s3, %s1227_s3 }
  0x27   :  { %p1234_p0 = por %p1233_p13, %p1232_p12 }
  0x29   :  { %p1235_p1 = pnand %p1234_p0, %p1228_p11 }
  0x2b   :  { %1238 = shalt.err (!%p1235_p1)
}
  0x2c   :  { %79 = dma.hbm_to_vmem [thread:$0]  %s1897_s5, 32, %s77_s27, [#allocation11]  }
  0x2d   :  { %s1239_s29 = scalar_lea.hbm %s1900_s8, 2048 }
  0x2e   :  { %p1240_p2 = scmp.ne.s32.totalorder %s1900_s8, %s1239_s29  ;;  %p1243_p3 = scmp.lt.u32.totalorder %s1239_s29, %s1900_s8 }
  0x30   :  { %p1245_p4 = pnand %p1243_p3, %p1240_p2 }
  0x32   :  { %1248 = shalt.err (!%p1245_p4)
}
  0x33   :  { %s1249_s20 = scalar_lea.vmem %s98_s30, 2048  ;;  %p1254_p6 = scmp.lt.s32.totalorder %s98_s30, %s98_s30 }
  0x34   :  { %p1250_p5 = scmp.ne.s32.totalorder %s98_s30, %s1249_s20  ;;  %p1255_p7 = scmp.lt.s32.totalorder %s1249_s20, %s1249_s20 }
  0x36   :  { %p1256_p8 = por %p1255_p7, %p1254_p6 }
  0x38   :  { %p1257_p9 = pnand %p1256_p8, %p1250_p5 }
  0x3a   :  { %1260 = shalt.err (!%p1257_p9)
}
  0x3b   :  { %103 = dma.hbm_to_vmem [thread:$0]  %s1900_s8, 2048, %s98_s30, [#allocation14], %s1452_s2, %s1452_s2, %s1453_s23  }
  0x3c   :  { %s1456_s21 = smov [#allocation16]   ;;  %s1457_s3 = smov [#allocation4]  }
  0x3d   :  { %s120_s22 = sshll.u32 %s1456_s21, 4  ;;  %s37_s28 = sshll.u32 %s1457_s3, 4  ;;  %s121_s22 = int_to_ptr.vmem [resolvable:$true] %s120_s22  ;;  %s38_s28 = int_to_ptr.vmem [resolvable:$true] %s37_s28 }
  0x3e   :  { %s1261_s26 = scalar_lea.hbm %s1902_s10, 32 }
  0x3f   :  { %p1262_p10 = scmp.ne.s32.totalorder %s1902_s10, %s1261_s26  ;;  %p1265_p11 = scmp.lt.u32.totalorder %s1261_s26, %s1902_s10 }
  0x41   :  { %p1267_p12 = pnand %p1265_p11, %p1262_p10 }
  0x43   :  { %1270 = shalt.err (!%p1267_p12)
}
  0x44   :  { %s1271_s8 = scalar_lea.vmem %s121_s22, 32  ;;  %p1276_p0 = scmp.lt.s32.totalorder %s121_s22, %s121_s22 }
  0x45   :  { %p1272_p13 = scmp.ne.s32.totalorder %s121_s22, %s1271_s8  ;;  %p1277_p1 = scmp.lt.s32.totalorder %s1271_s8, %s1271_s8 }
  0x47   :  { %p1278_p2 = por %p1277_p1, %p1276_p0 }
  0x49   :  { %p1279_p3 = pnand %p1278_p2, %p1272_p13 }
  0x4b   :  { %1282 = shalt.err (!%p1279_p3)
}
  0x4c   :  { %123 = dma.hbm_to_vmem [thread:$0]  %s1902_s10, 32, %s121_s22, [#allocation17]  }
  0x4d   :  { %s1918_s27 = sld [smem:[#allocation30_spill]] }
  0x53   :  { %s1283_s21 = scalar_lea.hbm %s1918_s27, 256 }
  0x54   :  { %p1284_p4 = scmp.ne.s32.totalorder %s1918_s27, %s1283_s21  ;;  %p1287_p5 = scmp.lt.u32.totalorder %s1283_s21, %s1918_s27 }
  0x56   :  { %p1289_p6 = pnand %p1287_p5, %p1284_p4 }
  0x58   :  { %1292 = shalt.err (!%p1289_p6)
}
  0x59   :  { %s1293_s29 = scalar_lea.vmem %s38_s28, 256  ;;  %p1298_p8 = scmp.lt.s32.totalorder %s38_s28, %s38_s28 }
  0x5a   :  { %p1294_p7 = scmp.ne.s32.totalorder %s38_s28, %s1293_s29  ;;  %p1299_p9 = scmp.lt.s32.totalorder %s1293_s29, %s1293_s29 }
  0x5c   :  { %p1300_p10 = por %p1299_p9, %p1298_p8 }
  0x5e   :  { %p1301_p11 = pnand %p1300_p10, %p1294_p7 }
  0x60   :  { %1304 = shalt.err (!%p1301_p11)
}
  0x61   :  { %s1458_s10 = smov 128   ;;  %s1459_s22 = smov 8  }
  0x62   :  { %43 = dma.hbm_to_vmem [thread:$0]  %s1918_s27, 256, %s38_s28, [#allocation5], %s1458_s10, %s1458_s10, %s1459_s22  }
  0x63   :  { %s1460_s19 = smov [#allocation9]   ;;  %s1461_s30 = smov [#allocation12]  }
  0x64   :  { %s63_s8 = sshll.u32 %s1460_s19, 4  ;;  %s86_s1 = sshll.u32 %s1461_s30, 4  ;;  %s64_s8 = int_to_ptr.vmem [resolvable:$true] %s63_s8  ;;  %s87_s1 = int_to_ptr.vmem [resolvable:$true] %s86_s1 }
  0x65   :  { %s1305_s21 = scalar_lea.hbm %s1896_s4, 2048 }
  0x66   :  { %p1306_p12 = scmp.ne.s32.totalorder %s1896_s4, %s1305_s21  ;;  %p1309_p13 = scmp.lt.u32.totalorder %s1305_s21, %s1896_s4 }
  0x68   :  { %p1311_p0 = pnand %p1309_p13, %p1306_p12 }
  0x6a   :  { %1314 = shalt.err (!%p1311_p0)
}
  0x6b   :  { %s1315_s28 = scalar_lea.vmem %s64_s8, 2048  ;;  %p1320_p2 = scmp.lt.s32.totalorder %s64_s8, %s64_s8 }
  0x6c   :  { %p1316_p1 = scmp.ne.s32.totalorder %s64_s8, %s1315_s28  ;;  %p1321_p3 = scmp.lt.s32.totalorder %s1315_s28, %s1315_s28 }
  0x6e   :  { %p1322_p4 = por %p1321_p3, %p1320_p2 }
  0x70   :  { %p1323_p5 = pnand %p1322_p4, %p1316_p1 }
  0x72   :  { %1326 = shalt.err (!%p1323_p5)
}
  0x73   :  { %69 = dma.hbm_to_vmem [thread:$0]  %s1896_s4, 2048, %s64_s8, [#allocation8], %s1452_s2, %s1452_s2, %s1453_s23  }
  0x74   :  { %s1327_s17 = scalar_lea.hbm %s1898_s6, 32 }
  0x75   :  { %p1328_p6 = scmp.ne.s32.totalorder %s1898_s6, %s1327_s17  ;;  %p1331_p7 = scmp.lt.u32.totalorder %s1327_s17, %s1898_s6 }
  0x77   :  { %p1333_p8 = pnand %p1331_p7, %p1328_p6 }
  0x79   :  { %1336 = shalt.err (!%p1333_p8)
}
  0x7a   :  { %s1337_s5 = scalar_lea.vmem %s87_s1, 32  ;;  %p1342_p10 = scmp.lt.s32.totalorder %s87_s1, %s87_s1 }
  0x7b   :  { %p1338_p9 = scmp.ne.s32.totalorder %s87_s1, %s1337_s5  ;;  %p1343_p11 = scmp.lt.s32.totalorder %s1337_s5, %s1337_s5 }
  0x7d   :  { %p1344_p12 = por %p1343_p11, %p1342_p10 }
  0x7f   :  { %p1345_p13 = pnand %p1344_p12, %p1338_p9 }
  0x81   :  { %1348 = shalt.err (!%p1345_p13)
}
  0x82   :  { %89 = dma.hbm_to_vmem [thread:$0]  %s1898_s6, 32, %s87_s1, [#allocation11]  }
  0x83   :  { %s1462_s21 = smov [#allocation15]   ;;  %s1463_s24 = smov [#allocation18]  }
  0x84   :  { %s110_s3 = sshll.u32 %s1462_s21, 4  ;;  %s129_s25 = sshll.u32 %s1463_s24, 4  ;;  %s111_s3 = int_to_ptr.vmem [resolvable:$true] %s110_s3  ;;  %s130_s25 = int_to_ptr.vmem [resolvable:$true] %s129_s25 }
  0x85   :  { %s1349_s27 = scalar_lea.hbm %s1901_s9, 32 }
  0x86   :  { %p1350_p0 = scmp.ne.s32.totalorder %s1901_s9, %s1349_s27  ;;  %p1353_p1 = scmp.lt.u32.totalorder %s1349_s27, %s1901_s9 }
  0x88   :  { %p1355_p2 = pnand %p1353_p1, %p1350_p0 }
  0x8a   :  { %1358 = shalt.err (!%p1355_p2)
}
  0x8b   :  { %s1359_s6 = scalar_lea.vmem %s111_s3, 32  ;;  %p1364_p4 = scmp.lt.s32.totalorder %s111_s3, %s111_s3 }
  0x8c   :  { %p1360_p3 = scmp.ne.s32.totalorder %s111_s3, %s1359_s6  ;;  %p1365_p5 = scmp.lt.s32.totalorder %s1359_s6, %s1359_s6 }
  0x8e   :  { %p1366_p6 = por %p1365_p5, %p1364_p4 }
  0x90   :  { %p1367_p7 = pnand %p1366_p6, %p1360_p3 }
  0x92   :  { %1370 = shalt.err (!%p1367_p7)
}
  0x93   :  { %113 = dma.hbm_to_vmem [thread:$0]  %s1901_s9, 32, %s111_s3, [#allocation14]  }
  0x94   :  { %s1371_s20 = scalar_lea.hbm %s1903_s11, 2048 }
  0x95   :  { %p1372_p8 = scmp.ne.s32.totalorder %s1903_s11, %s1371_s20  ;;  %p1375_p9 = scmp.lt.u32.totalorder %s1371_s20, %s1903_s11 }
  0x97   :  { %p1377_p10 = pnand %p1375_p9, %p1372_p8 }
  0x99   :  { %1380 = shalt.err (!%p1377_p10)
}
  0x9a   :  { %s1381_s24 = scalar_lea.vmem %s130_s25, 2048  ;;  %p1386_p12 = scmp.lt.s32.totalorder %s130_s25, %s130_s25 }
  0x9b   :  { %p1382_p11 = scmp.ne.s32.totalorder %s130_s25, %s1381_s24  ;;  %p1387_p13 = scmp.lt.s32.totalorder %s1381_s24, %s1381_s24 }
  0x9d   :  { %p1388_p0 = por %p1387_p13, %p1386_p12 }
  0x9f   :  { %p1389_p1 = pnand %p1388_p0, %p1382_p11 }
  0xa1   :  { %1392 = shalt.err (!%p1389_p1)
}
  0xa2   :  { %135 = dma.hbm_to_vmem [thread:$0]  %s1903_s11, 2048, %s130_s25, [#allocation17], %s1452_s2, %s1452_s2, %s1453_s23  }
  0xa3   :  { %s1464_s26 = smov [#allocation19]   ;;  %s1393_s10 = scalar_lea.hbm %s1904_s12, 2048 }
  0xa4   :  { %s141_s28 = sshll.u32 %s1464_s26, 4  ;;  %p1394_p2 = scmp.ne.s32.totalorder %s1904_s12, %s1393_s10  ;;  %s142_s28 = int_to_ptr.vmem [resolvable:$true] %s141_s28 }
  0xa5   :  { %p1397_p3 = scmp.lt.u32.totalorder %s1393_s10, %s1904_s12 }
  0xa7   :  { %p1399_p4 = pnand %p1397_p3, %p1394_p2 }
  0xa9   :  { %1402 = shalt.err (!%p1399_p4)
}
  0xaa   :  { %s1403_s0 = scalar_lea.vmem %s142_s28, 2048  ;;  %p1408_p6 = scmp.lt.s32.totalorder %s142_s28, %s142_s28 }
  0xab   :  { %p1404_p5 = scmp.ne.s32.totalorder %s142_s28, %s1403_s0  ;;  %p1409_p7 = scmp.lt.s32.totalorder %s1403_s0, %s1403_s0 }
  0xad   :  { %p1410_p8 = por %p1409_p7, %p1408_p6 }
  0xaf   :  { %p1411_p9 = pnand %p1410_p8, %p1404_p5 }
  0xb1   :  { %1414 = shalt.err (!%p1411_p9)
}
  0xb2   :  { %147 = dma.hbm_to_vmem [thread:$0]  %s1904_s12, 2048, %s142_s28, [#allocation20], %s1452_s2, %s1452_s2, %s1453_s23  }
  0xb3   :  { %1437 = dma.done.wait [#allocation5], 256  }
  0xb4   :  { %1438 = vsyncadd [#allocation5], 4294967040 }
  0xb5   :  { %1439 = dma.done.wait [#allocation8], 3072  }
  0xb6   :  { %1440 = vsyncadd [#allocation8], 4294964224 }
  0xb7   :  { %1441 = dma.done.wait [#allocation11], 64  }
  0xb8   :  { %1442 = vsyncadd [#allocation11], 4294967232 }
  0xb9   :  { %1443 = dma.done.wait [#allocation14], 2080  }
  0xba   :  { %1444 = vsyncadd [#allocation14], 4294965216 }
  0xbb   :  { %1445 = dma.done.wait [#allocation17], 2080  }
  0xbc   :  { %1446 = vsyncadd [#allocation17], 4294965216 }
  0xbd   :  { %1447 = dma.done.wait [#allocation20], 2048  }
  0xbe   :  { %1448 = vsyncadd [#allocation20], 4294965248  ;;  %v1465_v0 = vmov 0.0   ;;  %v187_v1 = vlaneseq  ;;  %v308_v3 = vld [vmem:[#allocation9 + $0x8] sm:$0xff]  ;;  %v310_v4 = vld [vmem:[#allocation9 + $0x18] sm:$0xff]  ;;  %s1919_s23 = sld [smem:[#allocation29_spill]] }
  0xbf   :  { %300 = vmatprep.mubr.f32.mxu0 %v1465_v0  ;;  %403 = vmatprep.mubr.f32.mxu1 %v1465_v0  ;;  %v307_v5 = vld [vmem:[#allocation9] sm:$0xff]  ;;  %v1062_v6 = vpack.c.bf16 %v310_v4, %v308_v3  ;;  %v309_v7 = vld [vmem:[#allocation9 + $0x10] sm:$0xff]  ;;  %v312_v8 = vld [vmem:[#allocation9 + $0x28] sm:$0xff]  ;;  %vm201_vm2 = vcmask 261120   ;;  %vm203_vm3 = vcmask 254976   ;;  %s1924_s20 = sld [smem:[#allocation31_spill]] }
  0xc0   :  { %v1702_v2 = vshrl.u32 %v187_v1, 7  ;;  %v314_v9 = vld [vmem:[#allocation9 + $0x38] sm:$0xff]  ;;  %v1064_v10 = vpack.c.bf16 %v309_v7, %v307_v5  ;;  %v311_v12 = vld [vmem:[#allocation9 + $0x20] sm:$0xff]  ;;  %v313_v13 = vld [vmem:[#allocation9 + $0x30] sm:$0xff]  ;;  %vm335_vm4 = vcmask 523264   ;;  %s1466_s6 = smov 64  }
  0xc1   :  { %v1066_v11 = vpack.c.bf16 %v314_v9, %v312_v8  ;;  %v214_v14 = vld [vmem:[#allocation7 + $0x8] sm:$0xff]  ;;  %1063 = vmatprep.subr.bf16.mxu1 %v1062_v6  ;;  %v216_v16 = vld [vmem:[#allocation7 + $0x18] sm:$0xff]  ;;  %v213_v17 = vld [vmem:[#allocation7] sm:$0xff]  ;;  %v1068_v20 = vpack.c.bf16 %v313_v13, %v311_v12  ;;  %vm435_vm5 = vcmask 516096   ;;  %vm1468_vm6 = vmmov 0  }
  0xc2   :  { %v189_v15 = vadd.s32 8, %v1702_v2  ;;  %v215_v18 = vld [vmem:[#allocation7 + $0x10] sm:$0xff]  ;;  %1065 = vmatpush1.bf16.msra.mxu1 %v1064_v10  ;;  %v1054_v21 = vpack.c.bf16 %v216_v16, %v214_v14  ;;  %v316_v23 = vld [vmem:[#allocation9 + $0x48] sm:$0xff]  ;;  %v318_v24 = vld [vmem:[#allocation9 + $0x58] sm:$0xff]  ;;  %v1733_v57 = vsub.s32 0, %v1702_v2  ;;  %v1738_v10 = vsub.s32 1, %v1702_v2 }
  0xc3   :  { %v1056_v22 = vpack.c.bf16 %v215_v18, %v213_v17  ;;  %v315_v25 = vld [vmem:[#allocation9 + $0x40] sm:$0xff]  ;;  %1067 = vmatprep.subr.bf16.mxu1 %v1066_v11  ;;  %v1070_v26 = vpack.c.bf16 %v318_v24, %v316_v23  ;;  %v317_v27 = vld [vmem:[#allocation9 + $0x50] sm:$0xff]  ;;  %v218_v28 = vld [vmem:[#allocation7 + $0x28] sm:$0xff]  ;;  %vm978_vm7 = vcmask 122880  }
  0xc4   :  { %v190_v19 = vstv %s1919_s23  ;;  %v220_v29 = vld [vmem:[#allocation7 + $0x38] sm:$0xff]  ;;  %1055 = vmatprep.subr.bf16.mxu0 %v1054_v21  ;;  %v217_v31 = vld [vmem:[#allocation7 + $0x20] sm:$0xff]  ;;  %v219_v32 = vld [vmem:[#allocation7 + $0x30] sm:$0xff]  ;;  %v1072_v38 = vpack.c.bf16 %v317_v27, %v315_v25 }
  0xc5   :  { %v1058_v30 = vpack.c.bf16 %v220_v29, %v218_v28  ;;  %v320_v33 = vld [vmem:[#allocation9 + $0x68] sm:$0xff]  ;;  %vm1709_vm0 = vcmp.eq.s32.totalorder %v1702_v2, %v190_v19  ;;  %vm1713_vm1 = vcmp.eq.s32.totalorder %v189_v15, %v190_v19  ;;  %1057 = vmatpush1.bf16.msra.mxu0 %v1056_v22  ;;  %v1060_v36 = vpack.c.bf16 %v219_v32, %v217_v31  ;;  %v322_v37 = vld [vmem:[#allocation9 + $0x78] sm:$0xff]  ;;  %v193_v39 = vld [vmem:[#allocation4] sm:$0xff] }
  0xc6   :  { %1069 = vmatpush1.bf16.msra.mxu1 %v1068_v20  ;;  %v194_v40 = vld [vmem:[#allocation4 + $0x8] sm:$0x3]  ;;  %v1074_v41 = vpack.c.bf16 %v322_v37, %v320_v33  ;;  %v319_v42 = vld [vmem:[#allocation9 + $0x60] sm:$0xff]  ;;  %v321_v43 = vld [vmem:[#allocation9 + $0x70] sm:$0xff]  ;;  %v199_v44 = vsel %vm1709_vm0, %v193_v39, 0.0 }
  0xc7   :  { %1059 = vmatprep.subr.bf16.mxu0 %v1058_v30  ;;  %1071 = vmatprep.subr.bf16.mxu1 %v1070_v26  ;;  %v200_v45 = vsel %vm1713_vm1, %v194_v40, 0.0  ;;  %v202_v46 = vsel %vm201_vm2, %v199_v44, 0.0  ;;  %v1076_v49 = vpack.c.bf16 %v321_v43, %v319_v42  ;;  %v1725_v52 = vld [vmem:[%s1924_s20] sm:$0x1]  ;;  %v323_v58 = vld [vmem:[#allocation12] sm:$0x3] }
  0xc8   :  { %v204_v47 = vsel %vm203_vm3, %v200_v45, 0.0  ;;  %v221_v59 = vld [vmem:[#allocation10] sm:$0x3]  ;;  %v328_v61 = vrot.slane %v323_v58, %v1733_v57  ;;  %v332_v11 = vrot.slane %v323_v58, %v1738_v10  ;;  %v540_v18 = vld [vmem:[#allocation13 + $0x8] sm:$0xff]  ;;  %v439_v20 = vld [vmem:[%s1899_s7 + $0x8] sm:$0xff] }
  0xc9   :  { %1061 = vmatpush1.bf16.msra.mxu0 %v1060_v36  ;;  %v205_v48 = vadd.f32 %v204_v47, %v202_v46  ;;  %v226_v63 = vrot.slane %v221_v59, %v1733_v57  ;;  %v230_v12 = vrot.slane %v221_v59, %v1738_v10  ;;  %v542_v19 = vld [vmem:[#allocation13 + $0x18] sm:$0xff]  ;;  %v441_v21 = vld [vmem:[%s1899_s7 + $0x18] sm:$0xff]  ;;  %v541_v23 = vld [vmem:[#allocation13 + $0x10] sm:$0xff] }
  0xca   :  { %1073 = vmatpush1.bf16.msra.mxu1 %v1072_v38  ;;  %v1094_v2 = vpack.c.bf16 %v542_v19, %v540_v18  ;;  %v539_v22 = vld [vmem:[#allocation13] sm:$0xff]  ;;  %v1078_v24 = vpack.c.bf16 %v441_v21, %v439_v20  ;;  %v438_v26 = vld [vmem:[%s1899_s7] sm:$0xff]  ;;  %v546_v30 = vld [vmem:[#allocation13 + $0x38] sm:$0xff] }
  0xcb   :  { %1075 = vmatprep.subr.bf16.mxu1 %v1074_v41  ;;  %v206_v50 = vrot.slane %v205_v48, 4  ;;  %v1096_v25 = vpack.c.bf16 %v541_v23, %v539_v22  ;;  %v440_v27 = vld [vmem:[%s1899_s7 + $0x10] sm:$0xff]  ;;  %v544_v28 = vld [vmem:[#allocation13 + $0x28] sm:$0xff]  ;;  %v443_v31 = vld [vmem:[%s1899_s7 + $0x28] sm:$0xff] }
  0xcc   :  { %v1080_v29 = vpack.c.bf16 %v440_v27, %v438_v26  ;;  %v445_v32 = vld [vmem:[%s1899_s7 + $0x38] sm:$0xff]  ;;  %1079 = vmatprep.subr.bf16.mxu0 %v1078_v24  ;;  %v1098_v34 = vpack.c.bf16 %v546_v30, %v544_v28  ;;  %v545_v37 = vld [vmem:[#allocation13 + $0x30] sm:$0xff]  ;;  %v444_v40 = vld [vmem:[%s1899_s7 + $0x30] sm:$0xff] }
  0xcd   :  { %v207_v51 = vadd.f32 %v206_v50, %v205_v48  ;;  %v1082_v35 = vpack.c.bf16 %v445_v32, %v443_v31  ;;  %v543_v36 = vld [vmem:[#allocation13 + $0x20] sm:$0xff]  ;;  %v442_v38 = vld [vmem:[%s1899_s7 + $0x20] sm:$0xff]  ;;  %v550_v42 = vld [vmem:[#allocation13 + $0x58] sm:$0xff] }
  0xce   :  { %1077 = vmatpush1.bf16.msra.mxu1 %v1076_v49  ;;  %v1100_v39 = vpack.c.bf16 %v545_v37, %v543_v36  ;;  %v548_v41 = vld [vmem:[#allocation13 + $0x48] sm:$0xff]  ;;  %v1084_v43 = vpack.c.bf16 %v444_v40, %v442_v38  ;;  %v447_v45 = vld [vmem:[%s1899_s7 + $0x48] sm:$0xff]  ;;  %v547_v47 = vld [vmem:[#allocation13 + $0x40] sm:$0xff] }
  0xcf   :  { %v208_v53 = vrot.slane %v207_v51, 2  ;;  %1095 = vmatprep.subr.bf16.mxu1 %v1094_v2  ;;  %v1102_v44 = vpack.c.bf16 %v550_v42, %v548_v41  ;;  %v449_v46 = vld [vmem:[%s1899_s7 + $0x58] sm:$0xff]  ;;  %v549_v49 = vld [vmem:[#allocation13 + $0x50] sm:$0xff]  ;;  %v454_v18 = vld [vmem:[#allocation15] sm:$0x3] }
  0xd0   :  { %v1086_v48 = vpack.c.bf16 %v449_v46, %v447_v45  ;;  %v446_v50 = vld [vmem:[%s1899_s7 + $0x40] sm:$0xff]  ;;  %v459_v19 = vrot.slane %v454_v18, %v1733_v57  ;;  %v463_v28 = vrot.slane %v454_v18, %v1738_v10  ;;  %v671_v38 = vld [vmem:[#allocation18 + $0x18] sm:$0xff]  ;;  %v771_v40 = vld [vmem:[#allocation19 + $0x10] sm:$0xff] }
  0xd1   :  { %v209_v54 = vadd.f32 %v208_v53, %v207_v51  ;;  %1017 = vmatmul.mubr.msk.f32.vlgmr.msra.gmra.mrb[0].mxu1 %vm335_vm4, %v1725_v52  ;;  %v448_v51 = vld [vmem:[%s1899_s7 + $0x50] sm:$0xff]  ;;  %v1104_v53 = vpack.c.bf16 %v549_v49, %v547_v47  ;;  %v669_v36 = vld [vmem:[#allocation18 + $0x8] sm:$0xff]  ;;  %v783_v18 = vld [vmem:[#allocation19 + $0x70] sm:$0xff] }
  0xd2   :  { %634 = vmatprep.mubr.f32.mxu1 %v1465_v0  ;;  %1097 = vmatpush1.bf16.msra.mxu1 %v1096_v25  ;;  %v1088_v58 = vpack.c.bf16 %v448_v51, %v446_v50  ;;  %v1110_v41 = vpack.c.bf16 %v671_v38, %v669_v36  ;;  %v774_v45 = vld [vmem:[#allocation19 + $0x28] sm:$0xff]  ;;  %v776_v47 = vld [vmem:[#allocation19 + $0x38] sm:$0xff] }
  0xd3   :  { %v210_v55 = vrot.slane %v209_v54, 1  ;;  %1099 = vmatprep.subr.bf16.mxu1 %v1098_v34  ;;  %v770_v34 = vld [vmem:[#allocation19 + $0x8] sm:$0xff]  ;;  %v675_v49 = vld [vmem:[#allocation18 + $0x38] sm:$0xff]  ;;  %v1130_v50 = vpack.c.bf16 %v776_v47, %v774_v45 }
  0xd5   :  { %v211_v56 = vadd.f32 %v210_v55, %v209_v54  ;;  %v552_v54 = vld [vmem:[#allocation13 + $0x68] sm:$0xff]  ;;  %v554_v55 = vld [vmem:[#allocation13 + $0x78] sm:$0xff] }
  0xd6   :  { %1101 = vmatpush1.bf16.msra.mxu1 %v1100_v39  ;;  %v1106_v59 = vpack.c.bf16 %v554_v55, %v552_v54  ;;  %v769_v39 = vld [vmem:[#allocation19] sm:$0xff]  ;;  %v775_v54 = vld [vmem:[#allocation19 + $0x30] sm:$0xff] }
  0xd7   :  { %1016 = vmatmul.mubr.msk.f32.vlgmr.msra.gmra.mrb[0].mxu0 %vm201_vm2, %v211_v56  ;;  %v451_v56 = vld [vmem:[%s1899_s7 + $0x68] sm:$0xff]  ;;  %1103 = vmatprep.subr.bf16.mxu1 %v1102_v44  ;;  %v1128_v42 = vpack.c.bf16 %v771_v40, %v769_v39  ;;  %v672_v55 = vld [vmem:[#allocation18 + $0x20] sm:$0xff] }
  0xd8   :  { %532 = vmatprep.mubr.f32.mxu0 %v1465_v0  ;;  %1081 = vmatpush1.bf16.msra.mxu0 %v1080_v29  ;;  %v670_v44 = vld [vmem:[#allocation18 + $0x10] sm:$0xff] }
  0xd9   :  { %1083 = vmatprep.subr.bf16.mxu0 %v1082_v35  ;;  %v772_v35 = vld [vmem:[#allocation19 + $0x18] sm:$0xff] }
  0xda   :  { %1105 = vmatpush1.bf16.msra.mxu1 %v1104_v53  ;;  %v1126_v37 = vpack.c.bf16 %v772_v35, %v770_v34  ;;  %v773_v53 = vld [vmem:[#allocation19 + $0x20] sm:$0xff] }
  0xdb   :  { %1107 = vmatprep.subr.bf16.mxu1 %v1106_v59  ;;  %v778_v59 = vld [vmem:[#allocation19 + $0x48] sm:$0xff] }
  0xdc   :  { %1085 = vmatpush1.bf16.msra.mxu0 %v1084_v43  ;;  %v668_v43 = vld [vmem:[#allocation18] sm:$0xff] }
  0xdd   :  { %1087 = vmatprep.subr.bf16.mxu0 %v1086_v48  ;;  %v1112_v46 = vpack.c.bf16 %v670_v44, %v668_v43  ;;  %v673_v48 = vld [vmem:[#allocation18 + $0x28] sm:$0xff] }
  0xde   :  { %v1114_v51 = vpack.c.bf16 %v675_v49, %v673_v48 }
  0xe0   :  { %1089 = vmatpush1.bf16.msra.mxu0 %v1088_v58  ;;  %v674_v58 = vld [vmem:[#allocation18 + $0x30] sm:$0xff] }
 0x1a4   :  { %v405_v60 = vpop.f32.mrb[0].mxu1 }
 0x1a5   :  { %v407_v62 = vpop.f32.mrb[1].mxu1  ;;  %v406_v1 = vadd.f32 %v405_v60, %v328_v61  ;;  %v453_v60 = vld [vmem:[%s1899_s7 + $0x78] sm:$0xff] }
 0x1a6   :  { %v408_v13 = vadd.f32 %v407_v62, %v332_v11  ;;  %v551_v61 = vld [vmem:[#allocation13 + $0x60] sm:$0xff]  ;;  %v553_v62 = vld [vmem:[#allocation13 + $0x70] sm:$0xff] }
 0x1aa   :  { %v302_v3 = vpop.f32.mrb[0].mxu0 }
 0x1ab   :  { %v303_v4 = vadd.f32 %v302_v3, %v226_v63  ;;  %v304_v5 = vpop.f32.mrb[1].mxu0  ;;  %v1090_v63 = vpack.c.bf16 %v453_v60, %v451_v56  ;;  %v1108_v3 = vpack.c.bf16 %v553_v62, %v551_v61  ;;  %v1132_v56 = vpack.c.bf16 %v775_v54, %v773_v53  ;;  %v780_v60 = vld [vmem:[#allocation19 + $0x58] sm:$0xff] }
 0x1ac   :  { %v305_v15 = vadd.f32 %v304_v5, %v230_v12  ;;  %v437_v5 = vld [vmem:[%s1924_s20 + $0x1] sm:$0x1]  ;;  %v1116_v61 = vpack.c.bf16 %v674_v58, %v672_v55  ;;  %v1134_v62 = vpack.c.bf16 %v780_v60, %v778_v59  ;;  %v899_v53 = vld [vmem:[%s1907_s15 + $0x10] sm:$0xff]  ;;  %v1467_v54 = vmov 0.0|0.0   ;;  %v900_v55 = vld [vmem:[%s1907_s15 + $0x18] sm:$0xff] }
 0x1ad   :  { %v410_v6 = vadd.f32 %v406_v1, %v303_v4  ;;  %v450_v1 = vld [vmem:[%s1899_s7 + $0x60] sm:$0xff]  ;;  %1091 = vmatprep.subr.bf16.mxu0 %v1090_v63  ;;  %1109 = vmatpush1.bf16.msra.mxu1 %v1108_v3  ;;  %v902_v59 = vld [vmem:[%s1907_s15 + $0x28] sm:$0xff] }
 0x1ae   :  { %1127 = vmatprep.subr.bf16.mxu1 %v1126_v37  ;;  %v677_v63 = vld [vmem:[#allocation18 + $0x48] sm:$0xff] }
 0x1af   :  { %v1018_v7 = vmul.f32 -1.442695, %v410_v6  ;;  %v901_v58 = vld [vmem:[%s1907_s15 + $0x20] sm:$0xff] }
 0x1b0   :  { %1020 = vmatmul.mubr.msk.f32.vlgmr.msra.gmra.mrb[2].mxu1 %vm335_vm4, %v437_v5  ;;  %v1149_v60 = vpack.c.bf16 %v902_v59, %v901_v58 }
 0x1b1   :  { %1173 = vpow2.f32 %v1018_v7  ;;  %864 = vmatprep.mubr.f32.mxu1 %v1465_v0  ;;  %1129 = vmatpush1.bf16.msra.mxu1 %v1128_v42 }
 0x1b2   :  { %1131 = vmatprep.subr.bf16.mxu1 %v1130_v50 }
 0x1b5   :  { %1133 = vmatpush1.bf16.msra.mxu1 %v1132_v56  ;;  %v1146_v56 = vpack.c.bf16 %v900_v55, %v899_v53 }
 0x1b6   :  { %1135 = vmatprep.subr.bf16.mxu1 %v1134_v62  ;;  %v903_v62 = vld [vmem:[%s1907_s15 + $0x30] sm:$0xff] }
 0x1bb   :  { %v1174_v8 = vpop.eup %1173 }
 0x1bc   :  { %v414_v9 = vadd.f32 1.0, %v1174_v8 }
 0x1be   :  { %1175 = vrcp.f32 %v414_v9 }
 0x1c8   :  { %v1742_v14 = vpop.eup %1175 }
 0x1c9   :  { %v417_v16 = vmul.f32 %v1742_v14, %v408_v13  ;;  %v420_v7 = vsub.f32 1.0, %v1742_v14 }
 0x1cb   :  { %v418_v17 = vadd.f32 %v417_v16, %v305_v15 }
 0x1cd   :  { %1177 = vtanh.f32 %v418_v17  ;;  %v555_v17 = vld [vmem:[#allocation16] sm:$0x3] }
 0x1ce   :  { %v564_v27 = vrot.slane %v555_v17, %v1738_v10 }
 0x1d7   :  { %v1178_v33 = vpop.eup %1177 }
 0x1d8   :  { %422 = vrot.lane.b32.xlu0 %v1178_v33, %s1466_s6 }
 0x1dc   :  { %426 = vrot.lane.b32.xlu0 %v1725_v52, %s1466_s6  ;;  %v452_v52 = vld [vmem:[%s1899_s7 + $0x70] sm:$0xff] }
 0x1dd   :  { %v1092_v4 = vpack.c.bf16 %v452_v52, %v450_v1  ;;  %v679_v1 = vld [vmem:[#allocation18 + $0x58] sm:$0xff]  ;;  %v777_v52 = vld [vmem:[#allocation19 + $0x40] sm:$0xff] }
 0x1de   :  { %v1118_v3 = vpack.c.bf16 %v679_v1, %v677_v63 }
 0x1df   :  { %1093 = vmatpush1.bf16.msra.mxu0 %v1092_v4  ;;  %v779_v4 = vld [vmem:[#allocation19 + $0x50] sm:$0xff] }
 0x1e0   :  { %657 = vrot.lane.b32.xlu0 %v437_v5, %s1466_s6  ;;  %1111 = vmatprep.subr.bf16.mxu0 %v1110_v41  ;;  %v676_v5 = vld [vmem:[#allocation18 + $0x40] sm:$0xff] }
 0x24a   :  { %v423_v6 = vpop.permute.xlu0 %422 }
 0x24b   :  { %v425_v9 = vmul.f32 %v423_v6, %v420_v7  ;;  %v678_v6 = vld [vmem:[#allocation18 + $0x50] sm:$0xff] }
 0x24e   :  { %v427_v8 = vpop.permute.xlu0 %426 }
 0x24f   :  { %v429_v11 = vmul.f32 %v1742_v14, %v427_v8  ;;  %v560_v14 = vrot.slane %v555_v17, %v1733_v57  ;;  %v1136_v8 = vpack.c.bf16 %v779_v4, %v777_v52  ;;  %v781_v17 = vld [vmem:[#allocation19 + $0x60] sm:$0xff] }
 0x251   :  { %v430_v12 = vadd.f32 %v429_v11, %v425_v9  ;;  %v782_v9 = vld [vmem:[#allocation19 + $0x68] sm:$0xff]  ;;  %v784_v11 = vld [vmem:[#allocation19 + $0x78] sm:$0xff]  ;;  %1137 = vmatpush1.bf16.msra.mxu1 %v1136_v8 }
 0x252   :  { %v905_v8 = vld [vmem:[%s1908_s16] sm:$0x1] }
 0x253   :  { %432 = vrot.lane.b32.xlu1 %v430_v12, %s1466_s6  ;;  %v681_v12 = vld [vmem:[#allocation18 + $0x68] sm:$0xff] }
 0x283   :  { %v636_v13 = vpop.f32.mrb[2].mxu1 }
 0x284   :  { %v638_v16 = vpop.f32.mrb[3].mxu1  ;;  %v637_v20 = vadd.f32 %v636_v13, %v560_v14  ;;  %v1120_v13 = vpack.c.bf16 %v678_v6, %v676_v5 }
 0x285   :  { %v639_v29 = vadd.f32 %v638_v16, %v564_v27  ;;  %v683_v16 = vld [vmem:[#allocation18 + $0x78] sm:$0xff] }
 0x286   :  { %v1122_v14 = vpack.c.bf16 %v683_v16, %v681_v12 }
 0x2c5   :  { %v433_v15 = vpop.permute.xlu1 %432 }
 0x2c6   :  { %436 = vst.msk [vmem:[%s1910_s18] sm:$0x1] %vm435_vm5, %v433_v15  ;;  %1019 = vmatmul.mubr.msk.f32.vlgmr.msra.gmra.mrb[2].mxu0 %vm335_vm4, %v433_v15  ;;  %v1138_v15 = vpack.c.bf16 %v784_v11, %v782_v9 }
 0x2c7   :  { %762 = vmatprep.mubr.f32.mxu0 %v1465_v0  ;;  %1113 = vmatpush1.bf16.msra.mxu0 %v1112_v46 }
 0x2c8   :  { %1115 = vmatprep.subr.bf16.mxu0 %v1114_v51  ;;  %1139 = vmatprep.subr.bf16.mxu1 %v1138_v15  ;;  %v898_v51 = vld [vmem:[%s1907_s15 + $0x8] sm:$0xff] }
 0x2cb   :  { %1117 = vmatpush1.bf16.msra.mxu0 %v1116_v61 }
 0x2cc   :  { %1119 = vmatprep.subr.bf16.mxu0 %v1118_v3 }
 0x2cf   :  { %1121 = vmatpush1.bf16.msra.mxu0 %v1120_v13 }
 0x2d0   :  { %1123 = vmatprep.subr.bf16.mxu0 %v1122_v14 }
 0x399   :  { %v534_v2 = vpop.f32.mrb[2].mxu0 }
 0x39a   :  { %v535_v21 = vadd.f32 %v534_v2, %v459_v19  ;;  %v536_v22 = vpop.f32.mrb[3].mxu0  ;;  %v680_v19 = vld [vmem:[#allocation18 + $0x60] sm:$0xff]  ;;  %v1140_v2 = vpack.c.bf16 %v783_v18, %v781_v17 }
 0x39b   :  { %v537_v32 = vadd.f32 %v536_v22, %v463_v28  ;;  %v667_v22 = vld [vmem:[%s1924_s20 + $0x2] sm:$0x1] }
 0x39c   :  { %v641_v23 = vadd.f32 %v637_v20, %v535_v21  ;;  %v682_v20 = vld [vmem:[#allocation18 + $0x70] sm:$0xff]  ;;  %1141 = vmatpush1.bf16.msra.mxu1 %v1140_v2 }
 0x39d   :  { %v1124_v21 = vpack.c.bf16 %v682_v20, %v680_v19 }
 0x39e   :  { %v1021_v24 = vmul.f32 -1.442695, %v641_v23  ;;  %v658_v23 = vpop.permute.xlu0 %657 }
 0x39f   :  { %1125 = vmatpush1.bf16.msra.mxu0 %v1124_v21  ;;  %1023 = vmatmul.mubr.msk.f32.vlgmr.msra.gmra.mrb[4].mxu1 %vm335_vm4, %v667_v22 }
 0x3a0   :  { %1179 = vpow2.f32 %v1021_v24  ;;  %1142 = vmatprep.subr.bf16.mxu0 %v1467_v54 }
 0x3aa   :  { %v1180_v25 = vpop.eup %1179 }
 0x3ab   :  { %v645_v26 = vadd.f32 1.0, %v1180_v25 }
 0x3ad   :  { %1181 = vrcp.f32 %v645_v26 }
 0x3b7   :  { %v1815_v30 = vpop.eup %1181 }
 0x3b8   :  { %v648_v31 = vmul.f32 %v1815_v30, %v639_v29  ;;  %v651_v24 = vsub.f32 1.0, %v1815_v30  ;;  %v660_v26 = vmul.f32 %v1815_v30, %v658_v23  ;;  %v785_v30 = vld [vmem:[%s1906_s14] sm:$0x3] }
 0x3b9   :  { %v790_v34 = vrot.slane %v785_v30, %v1733_v57  ;;  %v794_v44 = vrot.slane %v785_v30, %v1738_v10 }
 0x3ba   :  { %v649_v33 = vadd.f32 %v648_v31, %v537_v32 }
 0x3bc   :  { %1183 = vtanh.f32 %v649_v33  ;;  %v684_v33 = vld [vmem:[%s1905_s13] sm:$0x3] }
 0x3bd   :  { %v689_v35 = vrot.slane %v684_v33, %v1733_v57  ;;  %v693_v45 = vrot.slane %v684_v33, %v1738_v10  ;;  %v897_v57 = vld [vmem:[%s1907_s15] sm:$0xff] }
 0x3be   :  { %v1143_v10 = vpack.c.bf16 %v898_v51, %v897_v57 }
 0x3c6   :  { %v1184_v7 = vpop.eup %1183 }
 0x3c7   :  { %653 = vrot.lane.b32.xlu1 %v1184_v7, %s1466_s6 }
 0x439   :  { %v654_v25 = vpop.permute.xlu1 %653 }
 0x43a   :  { %v656_v27 = vmul.f32 %v654_v25, %v651_v24 }
 0x43c   :  { %v661_v28 = vadd.f32 %v660_v26, %v656_v27 }
 0x43e   :  { %663 = vrot.lane.b32.xlu1 %v661_v28, %s1466_s6 }
 0x442   :  { %887 = vrot.lane.b32.xlu1 %v667_v22, %s1466_s6 }
 0x472   :  { %v866_v29 = vpop.f32.mrb[4].mxu1 }
 0x473   :  { %v868_v32 = vpop.f32.mrb[5].mxu1  ;;  %v867_v36 = vadd.f32 %v866_v29, %v790_v34 }
 0x474   :  { %v869_v46 = vadd.f32 %v868_v32, %v794_v44 }
 0x4b0   :  { %v664_v31 = vpop.permute.xlu1 %663 }
 0x4b1   :  { %666 = vst.msk [vmem:[%s1910_s18 + $0x1] sm:$0x1] %vm435_vm5, %v664_v31  ;;  %1022 = vmatmul.mubr.msk.f32.vlgmr.msra.gmra.mrb[4].mxu0 %vm335_vm4, %v664_v31 }
 0x4b2   :  { %1051 = vmatprep.mubr.msk.f32.mxu0 %vm1468_vm6, %v1465_v0  ;;  %1144 = vmatpush3.bf16.msra.mxu0 %v1143_v10  ;;  %v904_v0 = vld [vmem:[%s1907_s15 + $0x38] sm:$0xff] }
 0x4b3   :  { %1145 = vmatprep.subr.bf16.mxu0 %v1467_v54  ;;  %v1152_v63 = vpack.c.bf16 %v904_v0, %v903_v62 }
 0x4b4   :  { %v888_v1 = vpop.permute.xlu1 %887 }
 0x4b6   :  { %1147 = vmatpush3.bf16.msra.mxu0 %v1146_v56 }
 0x4b7   :  { %1148 = vmatprep.subr.bf16.mxu0 %v1467_v54 }
 0x4ba   :  { %1150 = vmatpush3.bf16.msra.mxu0 %v1149_v60 }
 0x4bb   :  { %1151 = vmatprep.subr.bf16.mxu0 %v1467_v54 }
 0x4be   :  { %1153 = vmatpush3.bf16.msra.mxu0 %v1152_v63 }
 0x584   :  { %v764_v37 = vpop.f32.mrb[4].mxu0 }
 0x585   :  { %v765_v38 = vadd.f32 %v764_v37, %v689_v35  ;;  %v766_v39 = vpop.f32.mrb[5].mxu0 }
 0x586   :  { %v767_v49 = vadd.f32 %v766_v39, %v693_v45 }
 0x587   :  { %v871_v40 = vadd.f32 %v867_v36, %v765_v38 }
 0x589   :  { %v1024_v41 = vmul.f32 -1.442695, %v871_v40 }
 0x58b   :  { %1185 = vpow2.f32 %v1024_v41 }
 0x595   :  { %v1186_v42 = vpop.eup %1185 }
 0x596   :  { %v875_v43 = vadd.f32 1.0, %v1186_v42 }
 0x598   :  { %1187 = vrcp.f32 %v875_v43 }
 0x5a2   :  { %v1188_v47 = vpop.eup %1187 }
 0x5a3   :  { %v878_v48 = vmul.f32 %v1188_v47, %v869_v46  ;;  %v881_v52 = vsub.f32 1.0, %v1188_v47  ;;  %v890_v4 = vmul.f32 %v1188_v47, %v888_v1 }
 0x5a5   :  { %v879_v50 = vadd.f32 %v878_v48, %v767_v49 }
 0x5a7   :  { %1189 = vtanh.f32 %v879_v50 }
 0x5b1   :  { %v1190_v61 = vpop.eup %1189 }
 0x5b2   :  { %883 = vrot.lane.b32.xlu0 %v1190_v61, %s1466_s6 }
 0x624   :  { %v884_v3 = vpop.permute.xlu0 %883 }
 0x625   :  { %v886_v5 = vmul.f32 %v884_v3, %v881_v52 }
 0x627   :  { %v891_v6 = vadd.f32 %v890_v4, %v886_v5 }
 0x629   :  { %893 = vrot.lane.b32.xlu0 %v891_v6, %s1466_s6 }
 0x69b   :  { %v894_v7 = vpop.permute.xlu0 %893 }
 0x69c   :  { %896 = vst.msk [vmem:[%s1910_s18 + $0x2] sm:$0x1] %vm435_vm5, %v894_v7  ;;  %1052 = vmatmul.mubr.msk.f32.vlgmr.msra.gmra.mrb[6].mxu0 %vm335_vm4, %v894_v7  ;;  %s1469_s18 = smov [#allocation21]  }
 0x69d   :  { %s998_s16 = sshll.u32 %s1469_s18, 4  ;;  %s999_s16 = int_to_ptr.vmem [resolvable:$true] %s998_s16 }
 0x69e   :  { %s1415_s6 = scalar_lea.vmem %s999_s16, 16  ;;  %s1419_s22 = scalar_lea.vmem %s999_s16, 32 }
 0x69f   :  { %p1416_p10 = scmp.ne.s32.totalorder %s999_s16, %s1415_s6  ;;  %p1420_p11 = scmp.lt.s32.totalorder %s999_s16, %s999_s16 }
 0x6a0   :  { %p1421_p12 = scmp.lt.s32.totalorder %s1419_s22, %s1415_s6 }
 0x6a2   :  { %p1422_p13 = por %p1421_p12, %p1420_p11 }
 0x6a4   :  { %p1423_p0 = pnand %p1422_p13, %p1416_p10 }
 0x76f   :  { %v974_v9 = vpop.f32.mrb[6].mxu0 }
 0x770   :  { %v975_v11 = vadd.f32 %v974_v9, %v905_v8  ;;  %v1053_v12 = vpop.f32.mrb[7].mxu0 }
 0x772   :  { %v979_v13 = vsel %vm978_vm7, %v975_v11, -inf }
 0x773   :  { %980 = vmax.xlane.f32.xlu1 %v979_v13 }
 0x800   :  { %v981_v15 = vpop.xlane.xlu1 %980 }
 0x801   :  { %v982_v16 = vsub.f32 %v975_v11, %v981_v15 }
 0x803   :  { %v983_v17 = vmul.f32 1.442695, %v982_v16 }
 0x805   :  { %1191 = vpow2.f32 %v983_v17 }
 0x80f   :  { %v1192_v18 = vpop.eup %1191 }
 0x810   :  { %v985_v14 = vsel %vm978_vm7, %v1192_v18, 0.0 }
 0x811   :  { %986 = vadd.xlane.f32.xlu0 %v985_v14 }
 0x89e   :  { %v987_v19 = vpop.xlane.xlu0 %986 }
 0x89f   :  { %1193 = vlog2.f32 %v987_v19 }
 0x8a9   :  { %v1194_v20 = vpop.eup %1193 }
 0x8aa   :  { %v989_v2 = vmul.f32 0.6931472, %v1194_v20 }
 0x8ac   :  { %v990_v21 = vsub.f32 %v982_v16, %v989_v2 }
 0x8ae   :  { %991 = vst.msk [vmem:[#allocation21] sm:$0x1] %vm978_vm7, %v990_v21 }
 0x8af   :  { %1426 = shalt.err (!%p1423_p0)
}
 0x8b0   :  { %s1925_s20 = sld [smem:[#allocation32_spill]] }
 0x8b6   :  { %s1427_s0 = scalar_lea.hbm %s1925_s20, 16 }
 0x8b7   :  { %p1428_p1 = scmp.ne.s32.totalorder %s1925_s20, %s1427_s0  ;;  %p1431_p2 = scmp.lt.u32.totalorder %s1427_s0, %s1925_s20 }
 0x8b9   :  { %p1433_p3 = pnand %p1431_p2, %p1428_p1 }
 0x8bb   :  { %1436 = shalt.err (!%p1433_p3)
}
 0x8bc   :  { %1001 = dma.vmem_to_hbm [thread:$0]  %s999_s16, 16, %s1925_s20, [#allocation6]  }
 0x8bd   :  { %1449 = dma.done.wait [#allocation6], 16  }
 0x8be   :  { %1450 = vsyncadd [#allocation6], 4294967280 }
 0x8bf   :  { %1009 = vsyncpa [#allocation5], 1 }
 0x8c0   :  { %1010 = vsyncpa [#allocation8], 1 }
 0x8c1   :  { %1011 = vsyncpa [#allocation11], 1 }
 0x8c2   :  { %1012 = vsyncpa [#allocation14], 1 }
 0x8c3   :  { %1013 = vsyncpa [#allocation17], 1 }
 0x8c4   :  { %1014 = vsyncpa [#allocation20], 1 }
 0x8c5   :  { %1015 = vsyncpa [#allocation6], 1 }

</bundles_post_ra>
